<compile_context>
chip_gen: v5e
topology: v5e:2x2
jax: 0.10.0
libtpu: 0.0.40
codegen_flags: <defaults>
</compile_context>

<pallas_src>
import functools

import jax
import jax.numpy as jnp
from jax import lax
from jax.experimental import pallas as pl
from jax.experimental.pallas import tpu as pltpu

_LANES = 128


def _round_up(x, m):
    return (x + m - 1) // m * m


def _pow_gamma(q, gamma):
    """q ** gamma; repeated multiply for small integer gamma (avoids jnp.power)."""
    g = float(gamma)
    if g == 0.0:
        return jnp.ones_like(q)
    if g == round(g) and 1.0 <= g <= 8.0:
        r = q
        for _ in range(int(g) - 1):
            r = r * q
        return r
    return jnp.power(q, g)


def _focal_kernel(*refs, num_classes, gamma, chunk, s_valid,
                  has_alpha, has_weights, ragged):
    idx = 0
    if has_alpha:
        alpha_ref = refs[idx]; idx += 1          # (C,) f32 in SMEM
    logits_ref = refs[idx]; idx += 1             # (C, RB, 128) in VMEM
    targets_ref = refs[idx]; idx += 1            # (RB, 128) int32
    if has_weights:
        weights_ref = refs[idx]; idx += 1        # (RB, 128) f32
    out_ref = refs[idx]                          # (chunk, 128) f32 partial sums

    c = num_classes
    rb = logits_ref.shape[-2]
    n_full = rb // chunk
    tail = rb - n_full * chunk

    # Hoist per-class alpha scalar->vreg broadcasts out of the hot loop (JAX
    # does not CSE broadcast_in_dim).  Only hold full (chunk,128) broadcasts
    # for small C to bound vreg pressure; larger C uses scalars in the where.
    if has_alpha:
        if c <= 8:
            alpha_b = [jnp.full((chunk, _LANES), alpha_ref[k], jnp.float32)
                       for k in range(c)]
        else:
            alpha_b = [alpha_ref[k] for k in range(c)]

    if ragged:
        # Number of valid pixels in this spatial tile; only the last tile of
        # the last (partial) block is short.  Everything beyond is garbage
        # read from the partial HBM block and must be dropped.
        tile_limit = s_valid - pl.program_id(1) * (rb * _LANES)

    def compute_chunk(start, rows):
        t = targets_ref[pl.ds(start, rows), :]

        def xk(k):
            return logits_ref[k, pl.ds(start, rows), :].astype(jnp.float32)

        # Pass 1: per-pixel max over classes.  Re-load logits from VMEM per
        # pass instead of holding C live arrays (halves vreg pressure; vld
        # slots are cheap).
        m = xk(0)
        for k in range(1, c):
            m = jnp.maximum(m, xk(k))

        # Pass 2: log-softmax pieces + gather-at-target via a where chain.
        se = jnp.zeros((rows, _LANES), jnp.float32)
        zt = jnp.zeros((rows, _LANES), jnp.float32)
        if has_alpha:
            at = jnp.zeros((rows, _LANES), jnp.float32)
        else:
            ezt = jnp.zeros((rows, _LANES), jnp.float32)
        for k in range(c):
            z = xk(k) - m
            e = jnp.exp(z)
            se = se + e
            sel = t == k
            zt = jnp.where(sel, z, zt)
            if has_alpha:
                if c <= 8:
                    a_k = alpha_b[k] if rows == chunk else alpha_b[k][:rows]
                else:
                    a_k = alpha_b[k]
                at = jnp.where(sel, a_k, at)
            else:
                ezt = jnp.where(sel, e, ezt)

        log_se = jnp.log(se)
        if has_alpha:
            ce = at * (log_se - zt)       # = -alpha[t] * log_softmax(x)[t]
            pt = jnp.exp(-ce)             # = p_t ** alpha[t]  (needs the exp)
        else:
            ce = log_se - zt              # = -log_softmax(x)[t]
            # pt = p_t exactly; reuse exp(z_t) and a cheap EUP approximate
            # reciprocal instead of a second exp.
            pt = ezt * pl.reciprocal(se, approx=True)

        focal = _pow_gamma(1.0 - pt, gamma) * ce
        if has_weights:
            focal = focal * weights_ref[pl.ds(start, rows), :].astype(jnp.float32)
        if ragged:
            row_ids = lax.broadcasted_iota(jnp.int32, (rows, _LANES), 0) + start
            lane_ids = lax.broadcasted_iota(jnp.int32, (rows, _LANES), 1)
            pix = row_ids * _LANES + lane_ids
            # where() (not multiply) so NaN/Inf garbage in the OOB region of a
            # partial block can never poison the sum.
            focal = jnp.where(pix < tile_limit, focal, 0.0)
        return focal

    def body(i, acc):
        start = pl.multiple_of(i * chunk, chunk)
        return acc + compute_chunk(start, chunk)

    acc0 = jnp.zeros((chunk, _LANES), jnp.float32)
    unroll = 2 if (c <= 4 and n_full >= 2) else 1
    acc = lax.fori_loop(0, n_full, body, acc0, unroll=unroll)
    out_ref[...] = acc
    if tail:  # static: rb not a multiple of chunk
        out_ref[pl.ds(0, tail), :] = (out_ref[pl.ds(0, tail), :]
                                      + compute_chunk(n_full * chunk, tail))


def focal_loss_pallas(logits_nchw, targets_nhw, alpha=None, weights_nhw=None,
                      *, gamma=2.0, reduction="mean", max_tile_pixels=65536):
    """Focal loss. logits_nchw: (N,C,H,W), targets_nhw: (N,H,W) int,
    alpha: (C,) or None, weights_nhw: (N,H,W) or None."""
    if reduction not in ("mean", "sum"):
        # TODO(synk): reduction='none' needs a per-pixel output kernel variant.
        raise NotImplementedError("focal_loss_pallas supports reduction in {'mean','sum'}")

    n, c, h, w = logits_nchw.shape
    s = h * w
    has_alpha = alpha is not None
    has_weights = weights_nhw is not None

    # Metadata-only flatten of the spatial axes (no NCHW transpose, no copy).
    logits3 = logits_nchw.reshape(n, c, s)
    targets2 = targets_nhw.reshape(n, s).astype(jnp.int32)
    weights2 = (weights_nhw.reshape(n, s).astype(jnp.float32)
                if has_weights else None)

    s128 = _round_up(s, _LANES)
    if s128 != s:
        # TODO(synk): rare ragged-lane case (H*W % 128 != 0): this small pad is
        # still a copy pass over the logits; the padded values are never used
        # (masked in-kernel), only the lane-dense reshape needs a round shape.
        pad = s128 - s
        logits3 = jnp.pad(logits3, ((0, 0), (0, 0), (0, pad)))
        targets2 = jnp.pad(targets2, ((0, 0), (0, pad)))
        if has_weights:
            weights2 = jnp.pad(weights2, ((0, 0), (0, pad)))

    nbl = s128 // _LANES            # number of 128-pixel lane rows per image

    # Rows-per-tile cap: keep double-buffered per-step inputs <= ~12 MiB so an
    # explicit vmem_limit_bytes fits all generations (v7x: 64 MiB/TC physical;
    # v5e scoped default: 16 MiB) while tiles stay big enough to amortize the
    # ~0.35 us/step pipeline overhead.
    elt = jnp.dtype(logits_nchw.dtype).itemsize
    bytes_per_row = _LANES * (c * elt + 4 + (4 if has_weights else 0))
    vmem_budget = 12 << 20
    rb_cap = min(max(8, max_tile_pixels // _LANES),
                 max(8, vmem_budget // (2 * bytes_per_row)))
    rb_cap = max(8, (rb_cap // 8) * 8)
    if n == 1 and nbl > 16:
        # v7x has 2 TensorCores: a single-image call should still yield >=2
        # grid steps so both cores get work (no-op on v5e/v6e).
        rb_cap = min(rb_cap, _round_up(pl.cdiv(nbl, 2), 8))

    if nbl <= rb_cap:
        nb, rb = 1, nbl
    else:
        rb = rb_cap
        # Prefer an exact divisor (multiple of 8) near rb_cap so no grid step
        # reads a partial block; otherwise the last block is partial + masked.
        for cand in range(rb_cap, max(8, rb_cap // 2) - 1, -8):
            if nbl % cand == 0:
                rb = cand
                break
        nb = pl.cdiv(nbl, rb)
    ragged = (nb * rb * _LANES != s)

    logits4 = logits3.reshape(n, c, nbl, _LANES)        # metadata-only
    targets3 = targets2.reshape(n, nbl, _LANES)
    weights3 = weights2.reshape(n, nbl, _LANES) if has_weights else None

    chunk_pref = 16 if c <= 8 else 8
    chunk = min(chunk_pref, rb)

    kernel = functools.partial(
        _focal_kernel, num_classes=c, gamma=float(gamma), chunk=chunk,
        s_valid=s, has_alpha=has_alpha, has_weights=has_weights, ragged=ragged)

    args, in_specs = [], []
    if has_alpha:
        args.append(jnp.asarray(alpha, jnp.float32).reshape(c))
        in_specs.append(pl.BlockSpec(memory_space=pltpu.MemorySpace.SMEM))
    args.append(logits4)
    in_specs.append(pl.BlockSpec((None, c, rb, _LANES), lambda i, j: (i, 0, j, 0)))
    args.append(targets3)
    in_specs.append(pl.BlockSpec((None, rb, _LANES), lambda i, j: (i, j, 0)))
    if has_weights:
        args.append(weights3)
        in_specs.append(pl.BlockSpec((None, rb, _LANES), lambda i, j: (i, j, 0)))

    step_in_bytes = rb * bytes_per_row
    vmem_limit = int(min(64 << 20, max(8 << 20, 2 * step_in_bytes + (2 << 20))))

    cost = pl.CostEstimate(
        flops=int((8 * c + 16) * n * s),
        transcendentals=int((c + 2) * n * s),
        bytes_accessed=int(n * s128 * (bytes_per_row // _LANES)
                           + n * nb * chunk * _LANES * 4),
    )

    partials = pl.pallas_call(
        kernel,
        out_shape=jax.ShapeDtypeStruct((n, nb, chunk, _LANES), jnp.float32),
        grid_spec=pltpu.PrefetchScalarGridSpec(
            num_scalar_prefetch=0,
            grid=(n, nb),
            in_specs=in_specs,
            out_specs=pl.BlockSpec((None, None, chunk, _LANES),
                                   lambda i, j: (i, j, 0, 0)),
        ),
        compiler_params=pltpu.CompilerParams(
            dimension_semantics=("parallel", "parallel"),
            vmem_limit_bytes=vmem_limit),
        cost_estimate=cost,
    )(*args)

    total = jnp.sum(partials)
    if reduction == "sum":
        return total
    # NOTE: like the PyTorch reference, every pixel is counted in the mean
    # denominator (no ignore_index handling).
    return total / jnp.float32(n * h * w)


def focal_loss_ref(logits_nchw, targets_nhw, alpha, weights_nhw, gamma=2.0):
    n, c, h, w = logits_nchw.shape
    x = jnp.transpose(logits_nchw, (0, 2, 3, 1)).reshape(-1, c).astype(jnp.float32)
    t = targets_nhw.reshape(-1).astype(jnp.int32)
    wt = weights_nhw.reshape(-1).astype(jnp.float32)
    logp = jax.nn.log_softmax(x, axis=-1)
    logp_t = jnp.take_along_axis(logp, t[:, None], axis=-1)[:, 0]
    ce = -alpha[t] * logp_t
    pt = jnp.exp(-ce)
    focal = (1.0 - pt) ** gamma * ce * wt
    return jnp.mean(focal)


if __name__ == "__main__":
    key = jax.random.PRNGKey(0)
    k1, k2, k3 = jax.random.split(key, 3)

    # ---- Test 1: alpha + per-pixel weights (strict check) -------------------
    N, C, H, W = 2, 4, 16, 16
    logits = jax.random.normal(k1, (N, C, H, W), dtype=jnp.float32)
    targets = jax.random.randint(k2, (N, H, W), 0, C, dtype=jnp.int32)
    weights = jax.random.uniform(k3, (N, H, W), dtype=jnp.float32) + 0.5
    alpha = jnp.linspace(0.5, 1.5, C, dtype=jnp.float32)

    loss = jax.block_until_ready(
        focal_loss_pallas(logits, targets, alpha, weights, gamma=2.0))
    ref = focal_loss_ref(logits, targets, alpha, weights, gamma=2.0)
    assert jnp.allclose(loss, ref, rtol=1e-5, atol=1e-5), (loss, ref)

    # ---- Test 2: no alpha / no weights, ragged H*W (in-kernel mask path) ----
    # Loose tolerance: pt uses the approximate EUP reciprocal on this path.
    k4, k5 = jax.random.split(k1)
    N2, C2, H2, W2 = 1, 3, 17, 23
    logits_b = jax.random.normal(k4, (N2, C2, H2, W2), dtype=jnp.float32)
    targets_b = jax.random.randint(k5, (N2, H2, W2), 0, C2, dtype=jnp.int32)
    loss2 = jax.block_until_ready(focal_loss_pallas(logits_b, targets_b, gamma=2.0))
    ref2 = focal_loss_ref(logits_b, targets_b, jnp.ones((C2,), jnp.float32),
                          jnp.ones((N2, H2, W2), jnp.float32), gamma=2.0)
    assert jnp.allclose(loss2, ref2, rtol=2e-2, atol=1e-3), (loss2, ref2)

    # ---- Test 3: alpha, no weights, tail-chunk path (rb % chunk != 0) -------
    k6, k7 = jax.random.split(k2)
    N3, C3, H3, W3 = 2, 4, 48, 48          # 18 lane-rows -> chunk 16 + tail 2
    logits_c = jax.random.normal(k6, (N3, C3, H3, W3), dtype=jnp.float32)
    targets_c = jax.random.randint(k7, (N3, H3, W3), 0, C3, dtype=jnp.int32)
    alpha_c = jnp.linspace(0.8, 1.2, C3, dtype=jnp.float32)
    loss3 = jax.block_until_ready(
        focal_loss_pallas(logits_c, targets_c, alpha_c, gamma=2.0))
    ref3 = focal_loss_ref(logits_c, targets_c, alpha_c,
                          jnp.ones((N3, H3, W3), jnp.float32), gamma=2.0)
    assert jnp.allclose(loss3, ref3, rtol=1e-4, atol=1e-5), (loss3, ref3)

    # ---- Test 4: forced spatial split with a partial (masked) last block ----
    loss4 = jax.block_until_ready(
        focal_loss_pallas(logits_c, targets_c, alpha_c, gamma=2.0,
                          max_tile_pixels=1024))
    assert jnp.allclose(loss4, ref3, rtol=1e-4, atol=1e-5), (loss4, ref3)

    print("KERNEL_OK")
</pallas_src>

<mosaic_0001>
module attributes {stable_mosaic.version = 11 : i64} {
  func.func @_focal_kernel(%arg0: i32, %arg1: i32, %arg2: memref<4xf32, #tpu.memory_space<smem>>, %arg3: memref<1x4x2x128xf32, #tpu.memory_space<vmem>>, %arg4: memref<1x2x128xi32, #tpu.memory_space<vmem>>, %arg5: memref<1x2x128xf32, #tpu.memory_space<vmem>>, %arg6: memref<1x1x2x128xf32, #tpu.memory_space<vmem>>) attributes {dimension_semantics = [#tpu.dimension_semantics<parallel>, #tpu.dimension_semantics<parallel>], iteration_bounds = array<i64: 2, 1>, scalar_prefetch = 0 : i64, scratch_operands = 0 : i64, tpu.core_type = #tpu.core_type<tc>, window_params = [{transform_indices = @transform_0, window_bounds = array<i64: 4>}, {transform_indices = @transform_1, window_bounds = array<i64: 1, 4, 2, 128>}, {transform_indices = @transform_2, window_bounds = array<i64: 1, 2, 128>}, {transform_indices = @transform_3, window_bounds = array<i64: 1, 2, 128>}, {transform_indices = @transform_4, window_bounds = array<i64: 1, 1, 2, 128>}]} {
    %c0 = arith.constant 0 : index
    %0 = memref.load %arg2[%c0] : memref<4xf32, #tpu.memory_space<smem>>
    %1 = vector.broadcast %0 : f32 to vector<2x128xf32>
    %c1 = arith.constant 1 : index
    %2 = memref.load %arg2[%c1] : memref<4xf32, #tpu.memory_space<smem>>
    %3 = vector.broadcast %2 : f32 to vector<2x128xf32>
    %c2 = arith.constant 2 : index
    %4 = memref.load %arg2[%c2] : memref<4xf32, #tpu.memory_space<smem>>
    %5 = vector.broadcast %4 : f32 to vector<2x128xf32>
    %c3 = arith.constant 3 : index
    %6 = memref.load %arg2[%c3] : memref<4xf32, #tpu.memory_space<smem>>
    %7 = vector.broadcast %6 : f32 to vector<2x128xf32>
    %cst = arith.constant 0.000000e+00 : f32
    %8 = vector.broadcast %cst : f32 to vector<2x128xf32>
    %c0_i32 = arith.constant 0 : i32
    %c2_i32 = arith.constant 2 : i32
    %9 = arith.muli %c0_i32, %c2_i32 : i32
    %10 = tpu.assume_multiple %9, 2 : i32
    %c0_0 = arith.constant 0 : index
    %11 = arith.index_cast %10 : i32 to index
    %c0_1 = arith.constant 0 : index
    %12 = vector.load %arg4[%c0_0, %11, %c0_1] : memref<1x2x128xi32, #tpu.memory_space<vmem>>, vector<1x2x128xi32>
    %13 = vector.shape_cast %12 : vector<1x2x128xi32> to vector<2x128xi32>
    %c0_2 = arith.constant 0 : index
    %c0_3 = arith.constant 0 : index
    %14 = arith.index_cast %10 : i32 to index
    %c0_4 = arith.constant 0 : index
    %15 = vector.load %arg3[%c0_2, %c0_3, %14, %c0_4] : memref<1x4x2x128xf32, #tpu.memory_space<vmem>>, vector<1x1x2x128xf32>
    %16 = vector.shape_cast %15 : vector<1x1x2x128xf32> to vector<2x128xf32>
    %c0_5 = arith.constant 0 : index
    %c1_6 = arith.constant 1 : index
    %17 = arith.index_cast %10 : i32 to index
    %c0_7 = arith.constant 0 : index
    %18 = vector.load %arg3[%c0_5, %c1_6, %17, %c0_7] : memref<1x4x2x128xf32, #tpu.memory_space<vmem>>, vector<1x1x2x128xf32>
    %19 = vector.shape_cast %18 : vector<1x1x2x128xf32> to vector<2x128xf32>
    %20 = arith.maximumf %16, %19 : vector<2x128xf32>
    %c0_8 = arith.constant 0 : index
    %c2_9 = arith.constant 2 : index
    %21 = arith.index_cast %10 : i32 to index
    %c0_10 = arith.constant 0 : index
    %22 = vector.load %arg3[%c0_8, %c2_9, %21, %c0_10] : memref<1x4x2x128xf32, #tpu.memory_space<vmem>>, vector<1x1x2x128xf32>
    %23 = vector.shape_cast %22 : vector<1x1x2x128xf32> to vector<2x128xf32>
    %24 = arith.maximumf %20, %23 : vector<2x128xf32>
    %c0_11 = arith.constant 0 : index
    %c3_12 = arith.constant 3 : index
    %25 = arith.index_cast %10 : i32 to index
    %c0_13 = arith.constant 0 : index
    %26 = vector.load %arg3[%c0_11, %c3_12, %25, %c0_13] : memref<1x4x2x128xf32, #tpu.memory_space<vmem>>, vector<1x1x2x128xf32>
    %27 = vector.shape_cast %26 : vector<1x1x2x128xf32> to vector<2x128xf32>
    %28 = arith.maximumf %24, %27 : vector<2x128xf32>
    %cst_14 = arith.constant 0.000000e+00 : f32
    %29 = vector.broadcast %cst_14 : f32 to vector<2x128xf32>
    %cst_15 = arith.constant 0.000000e+00 : f32
    %30 = vector.broadcast %cst_15 : f32 to vector<2x128xf32>
    %cst_16 = arith.constant 0.000000e+00 : f32
    %31 = vector.broadcast %cst_16 : f32 to vector<2x128xf32>
    %c0_17 = arith.constant 0 : index
    %c0_18 = arith.constant 0 : index
    %32 = arith.index_cast %10 : i32 to index
    %c0_19 = arith.constant 0 : index
    %33 = vector.load %arg3[%c0_17, %c0_18, %32, %c0_19] : memref<1x4x2x128xf32, #tpu.memory_space<vmem>>, vector<1x1x2x128xf32>
    %34 = vector.shape_cast %33 : vector<1x1x2x128xf32> to vector<2x128xf32>
    %35 = arith.subf %34, %28 : vector<2x128xf32>
    %36 = math.exp %35 : vector<2x128xf32>
    %37 = arith.addf %29, %36 : vector<2x128xf32>
    %c0_i32_20 = arith.constant 0 : i32
    %38 = vector.broadcast %c0_i32_20 : i32 to vector<2x128xi32>
    %39 = arith.cmpi eq, %13, %38 : vector<2x128xi32>
    %40 = arith.select %39, %35, %30 : vector<2x128xi1>, vector<2x128xf32>
    %41 = arith.select %39, %1, %31 : vector<2x128xi1>, vector<2x128xf32>
    %c0_21 = arith.constant 0 : index
    %c1_22 = arith.constant 1 : index
    %42 = arith.index_cast %10 : i32 to index
    %c0_23 = arith.constant 0 : index
    %43 = vector.load %arg3[%c0_21, %c1_22, %42, %c0_23] : memref<1x4x2x128xf32, #tpu.memory_space<vmem>>, vector<1x1x2x128xf32>
    %44 = vector.shape_cast %43 : vector<1x1x2x128xf32> to vector<2x128xf32>
    %45 = arith.subf %44, %28 : vector<2x128xf32>
    %46 = math.exp %45 : vector<2x128xf32>
    %47 = arith.addf %37, %46 : vector<2x128xf32>
    %c1_i32 = arith.constant 1 : i32
    %48 = vector.broadcast %c1_i32 : i32 to vector<2x128xi32>
    %49 = arith.cmpi eq, %13, %48 : vector<2x128xi32>
    %50 = arith.select %49, %45, %40 : vector<2x128xi1>, vector<2x128xf32>
    %51 = arith.select %49, %3, %41 : vector<2x128xi1>, vector<2x128xf32>
    %c0_24 = arith.constant 0 : index
    %c2_25 = arith.constant 2 : index
    %52 = arith.index_cast %10 : i32 to index
    %c0_26 = arith.constant 0 : index
    %53 = vector.load %arg3[%c0_24, %c2_25, %52, %c0_26] : memref<1x4x2x128xf32, #tpu.memory_space<vmem>>, vector<1x1x2x128xf32>
    %54 = vector.shape_cast %53 : vector<1x1x2x128xf32> to vector<2x128xf32>
    %55 = arith.subf %54, %28 : vector<2x128xf32>
    %56 = math.exp %55 : vector<2x128xf32>
    %57 = arith.addf %47, %56 : vector<2x128xf32>
    %c2_i32_27 = arith.constant 2 : i32
    %58 = vector.broadcast %c2_i32_27 : i32 to vector<2x128xi32>
    %59 = arith.cmpi eq, %13, %58 : vector<2x128xi32>
    %60 = arith.select %59, %55, %50 : vector<2x128xi1>, vector<2x128xf32>
    %61 = arith.select %59, %5, %51 : vector<2x128xi1>, vector<2x128xf32>
    %c0_28 = arith.constant 0 : index
    %c3_29 = arith.constant 3 : index
    %62 = arith.index_cast %10 : i32 to index
    %c0_30 = arith.constant 0 : index
    %63 = vector.load %arg3[%c0_28, %c3_29, %62, %c0_30] : memref<1x4x2x128xf32, #tpu.memory_space<vmem>>, vector<1x1x2x128xf32>
    %64 = vector.shape_cast %63 : vector<1x1x2x128xf32> to vector<2x128xf32>
    %65 = arith.subf %64, %28 : vector<2x128xf32>
    %66 = math.exp %65 : vector<2x128xf32>
    %67 = arith.addf %57, %66 : vector<2x128xf32>
    %c3_i32 = arith.constant 3 : i32
    %68 = vector.broadcast %c3_i32 : i32 to vector<2x128xi32>
    %69 = arith.cmpi eq, %13, %68 : vector<2x128xi32>
    %70 = arith.select %69, %65, %60 : vector<2x128xi1>, vector<2x128xf32>
    %71 = arith.select %69, %7, %61 : vector<2x128xi1>, vector<2x128xf32>
    %72 = math.log %67 : vector<2x128xf32>
    %73 = arith.subf %72, %70 : vector<2x128xf32>
    %74 = arith.mulf %71, %73 : vector<2x128xf32>
    %cst_31 = arith.constant 0.000000e+00 : f32
    %75 = vector.broadcast %cst_31 : f32 to vector<2x128xf32>
    %76 = arith.subf %75, %74 : vector<2x128xf32>
    %77 = math.exp %76 : vector<2x128xf32>
    %cst_32 = arith.constant 1.000000e+00 : f32
    %78 = vector.broadcast %cst_32 : f32 to vector<2x128xf32>
    %79 = arith.subf %78, %77 : vector<2x128xf32>
    %80 = arith.mulf %79, %79 : vector<2x128xf32>
    %81 = arith.mulf %80, %74 : vector<2x128xf32>
    %c0_33 = arith.constant 0 : index
    %82 = arith.index_cast %10 : i32 to index
    %c0_34 = arith.constant 0 : index
    %83 = vector.load %arg5[%c0_33, %82, %c0_34] : memref<1x2x128xf32, #tpu.memory_space<vmem>>, vector<1x2x128xf32>
    %84 = vector.shape_cast %83 : vector<1x2x128xf32> to vector<2x128xf32>
    %85 = arith.mulf %81, %84 : vector<2x128xf32>
    %86 = arith.addf %8, %85 : vector<2x128xf32>
    %c1_i32_35 = arith.constant 1 : i32
    %c0_36 = arith.constant 0 : index
    %c0_37 = arith.constant 0 : index
    %c0_38 = arith.constant 0 : index
    %c0_39 = arith.constant 0 : index
    %87 = vector.load %arg6[%c0_36, %c0_37, %c0_38, %c0_39] : memref<1x1x2x128xf32, #tpu.memory_space<vmem>>, vector<1x1x2x128xf32>
    %88 = vector.shape_cast %87 : vector<1x1x2x128xf32> to vector<2x128xf32>
    %89 = vector.shape_cast %86 : vector<2x128xf32> to vector<1x1x2x128xf32>
    tpu.vector_store %arg6[%c0_36, %c0_37, %c0_38, %c0_39], %89 {strides = array<i32>} : memref<1x1x2x128xf32, #tpu.memory_space<vmem>>, vector<1x1x2x128xf32>,
    return
  }
  func.func @transform_0(%arg0: i32, %arg1: i32) -> i32 {
    %c0_i32 = arith.constant 0 : i32
    %c0_i32_0 = arith.constant 0 : i32
    return %c0_i32 : i32
  }
  func.func @transform_1(%arg0: i32, %arg1: i32) -> (i32, i32, i32, i32) {
    %c0_i32 = arith.constant 0 : i32
    %c0_i32_0 = arith.constant 0 : i32
    %c0_i32_1 = arith.constant 0 : i32
    return %arg0, %c0_i32, %arg1, %c0_i32_0 : i32, i32, i32, i32
  }
  func.func @transform_2(%arg0: i32, %arg1: i32) -> (i32, i32, i32) {
    %c0_i32 = arith.constant 0 : i32
    %c0_i32_0 = arith.constant 0 : i32
    return %arg0, %arg1, %c0_i32 : i32, i32, i32
  }
  func.func @transform_3(%arg0: i32, %arg1: i32) -> (i32, i32, i32) {
    %c0_i32 = arith.constant 0 : i32
    %c0_i32_0 = arith.constant 0 : i32
    return %arg0, %arg1, %c0_i32 : i32, i32, i32
  }
  func.func @transform_4(%arg0: i32, %arg1: i32) -> (i32, i32, i32, i32) {
    %c0_i32 = arith.constant 0 : i32
    %c0_i32_0 = arith.constant 0 : i32
    %c0_i32_1 = arith.constant 0 : i32
    return %arg0, %arg1, %c0_i32, %c0_i32_0 : i32, i32, i32, i32
  }
}

</mosaic_0001>

<bundles_post_ra>
// kernel: tpu_custom_call.1
= control target key start
LH: loop header
LB: loop body
LE: loop exit
PB: predicated region body
PF: predicated region fallthrough
CT: control target
= control target key end

     0   :  { %s1093_s0 = inlined_call_operand.hbm [shape: f32[4], index: 0, kind: input, shape index: {}]   ;;  %s1094_s1 = inlined_call_operand.hbm [shape: f32[2,4,2,128], index: 1, kind: input, shape index: {}]   ;;  %s1095_s2 = inlined_call_operand.hbm [shape: s32[2,2,128], index: 2, kind: input, shape index: {}]   ;;  %s1096_s3 = inlined_call_operand.hbm [shape: f32[2,2,128], index: 3, kind: input, shape index: {}]   ;;  %s1097_s4 = inlined_call_operand.hbm [shape: f32[2,1,2,128], index: 4, kind: output, shape index: {}]  }
   0x1   :  { %1102 = sst [smem:[#allocation19_spill]] %s1093_s0 }
   0x2   :  { %1103 = sst [smem:[#allocation20_spill]] %s1095_s2 }
   0x3   :  { %1104 = sst [smem:[#allocation21_spill]] %s1096_s3 }
   0x4   :  { %9 = vsyncpa [#allocation5], 0 }
   0x5   :  { %10 = vsyncpa [#allocation3], 0 }
   0x6   :  { %12 = vsyncpa [#allocation3 + $0x1], 0 }
   0x7   :  { %13 = vsyncpa [#allocation8], 0 }
   0x8   :  { %15 = vsyncpa [#allocation8 + $0x1], 0 }
   0x9   :  { %16 = vsyncpa [#allocation4], 0 }
   0xa   :  { %18 = vsyncpa [#allocation4 + $0x1], 0  ;;  %s903_s15 = smov 0   ;;  %s905_s16 = smov 0  }
   0xb   :  { %s907_s17 = smov 0   ;;  %s909_s18 = smov 0  }
   0xc   :  { %s911_s19 = smov 0   ;;  %s913_s20 = smov 0  }
   0xd LB: > { %1105 = sst [smem:[#allocation15_spill]] %s861_s17  ;;  %s36_s21 = sadd.s32 1, %s869_s19  ;;  %s873_s20 = sphi %s913_s20, %s24_s20   ;;  %s869_s19 = sphi %s911_s19, %s1121_s19   ;;  %s865_s18 = sphi %s909_s18, %s1120_s18   ;;  %s861_s17 = sphi %s907_s17, %s1119_s17   ;;  %s857_s16 = sphi %s905_s16, %s1123_s16   ;;  %s853_s15 = sphi %s903_s15, %s1122_s15  }
   0xe   : > { %1106 = sst [smem:[#allocation16_spill]] %s869_s19  ;;  %s66_s22 = sadd.s32 1, %s861_s17 }
   0xf   : > { %p38_p0 = scmp.ge.s32.totalorder %s36_s21, 2  ;;  %p73_p1 = scmp.ne.s32.totalorder %s861_s17, %s857_s16 }
  0x10   : > { %p74_p2 = scmp.eq.s32.totalorder %s873_s20, 0  ;;  %p556_p3 = scmp.ge.s32.totalorder %s873_s20, 2 }
  0x11   : > { %s1125_s21 = smov (%p38_p0, %s36_s21), 0  ;;  %p612_p5 = scmp.lt.s32.totalorder %s873_s20, 2 }
  0x12   : > { %1107 = sst [smem:[#allocation17_spill]] %s1125_s21  ;;  %p75_p4 = por %p74_p2, %p73_p1 }
  0x13   : > { %s61_s23 = ssub.s32 %s869_s19, %s1125_s21  ;;  %s948_s24 = sand.u32 1, %s861_s17  }
  0x14   : > { %p64_p6 = scmp.eq.s32.totalorder %s61_s23, 0  ;;  %p950_p7 = pnand %p612_p5, %p75_p4 }
  0x15   : > { %s220_s26 = sand.u32 1, %s873_s20   ;;  %s1098_s27 = sshll.u32 %s948_s24, 1 }
  0x16   : > { %s957_s28 = scalar_select %p64_p6, %s861_s17, %s66_s22  }
  0x17   : > { %s561_s29 = sshll.u32 %s869_s19, 1  ;;  %s1110_s2 = sld [smem:[#allocation20_spill]] }
  0x18   : > { %1109 = sst [smem:[#allocation18_spill]] %s957_s28  ;;  %s224_s7 = scalar_lea.vmem [#allocation7], %s1098_s27 }
  0x19   : > { %s233_s8 = sshll.u32 %s224_s7, 4  ;;  %s965_s10 = scalar_lea.sflag [#allocation8], %s220_s26  ;;  %s234_s8 = int_to_ptr.vmem [resolvable:$true] %s233_s8 }
  0x1a   : > { %s1111_s3 = sld [smem:[#allocation21_spill]]  ;;  %s976_s14 = sadd.s32 4294967295, %s873_s20  }
  0x1b   : > { %s553_s22 = sadd.s32 4294967294, %s873_s20   ;;  %p79_p8 = scmp.ne.s32.totalorder %s857_s16, %s853_s15 }
  0x1c   : > { %p80_p9 = scmp.eq.s32.totalorder %s976_s14, 0  ;;  %p161_p10 = scmp.eq.s32.totalorder %s976_s14, 1 }
  0x1d   : > { %s229_s6 = scalar_lea.hbm %s1110_s2, %s561_s29  ;;  %p167_p11 = scmp.eq.s32.totalorder %s553_s22, 1 }
  0x1e   : > { %s231_s9 = sshll.u32 %s229_s6, 4  ;;  %p554_p12 = scmp.ge.s32.totalorder %s873_s20, 1  ;;  %s232_s9 = int_to_ptr.hbm [resolvable:$true] %s231_s9 }
  0x1f   : > { %603 = dma.hbm_to_vmem [thread:$0]  (!%p950_p7), %s232_s9, 32, %s234_s8, %s965_s10  }
  0x20   : > { %s973_s13 = scalar_lea.hbm %s1111_s3, %s561_s29  ;;  %p986_p13 = por %p80_p9, %p79_p8 }
  0x21   : > { %p993_p0 = por %p161_p10, %p73_p1  ;;  %p997_p2 = por %p167_p11, %p79_p8 }
  0x22   : > { %p174_p4 = scmp.lt.s32.totalorder %s873_s20, 3  ;;  %s1115_s0 = sld [smem:[#allocation19_spill]] }
  0x23   : > { %s557_s8 = sshll.u32 %s948_s24, 3  ;;  %s580_s9 = sshll.u32 %s869_s19, 3 }
  0x24   : > { %p1005_p5 = pnand %p554_p12, %p174_p4  ;;  %s207_s22 = scalar_lea.hbm %s1094_s1, %s580_s9 }
  0x25   : > { %s208_s30 = sshll.u32 %s207_s22, 4  ;;  %s201_s5 = scalar_lea.vmem [#allocation6], %s557_s8  ;;  %s209_s30 = int_to_ptr.hbm [resolvable:$true] %s208_s30 }
  0x26   : > { %p593_p1 = pneg %p1005_p5  ;;  %s210_s27 = sshll.u32 %s201_s5, 4  ;;  %s211_s27 = int_to_ptr.vmem [resolvable:$true] %s210_s27 }
  0x27   : > { %s251_s2 = sshll.u32 %s973_s13, 4  ;;  %s198_s3 = scalar_lea.sflag [#allocation3], %s948_s24  ;;  %s252_s2 = int_to_ptr.hbm [resolvable:$true] %s251_s2 }
  0x28   : > { %s186_s6 = sshll.u32 %s1115_s0, 4  ;;  %p594_p6 = pnand %p593_p1, %p80_p9  ;;  %s187_s6 = int_to_ptr.hbm [resolvable:$true] %s186_s6 }
  0x29   : > { %s875_s0 = smov [#allocation2]   ;;  %s876_s21 = smov 32  }
  0x2a   : > { %596 = dma.hbm_to_smem (!%p594_p6), %s187_s6, 16, %s875_s0, [#allocation5]  }
  0x2b   : > { %s877_s19 = smov 2   ;;  %s1117_s28 = sshll.u32 %s948_s24, 1 }
  0x2c   : > { %600 = dma.hbm_to_vmem [thread:$0]  (!%p950_p7), %s209_s30, 128, %s211_s27, %s198_s3, %s876_s21, %s876_s21, %s877_s19  }
  0x2d   : > { %s244_s17 = scalar_lea.vmem [#allocation9], %s1117_s28  ;;  %262 = sbr.rel (%p1005_p5) target bundleno = 120 (0x78), region = 36 }
  0x2e   : > { %s253_s11 = sshll.u32 %s244_s17, 4  ;;  %s254_s11 = int_to_ptr.vmem [resolvable:$true] %s253_s11 }
  0x2f   : > { %606 = dma.hbm_to_vmem [thread:$0]  (!%p950_p7), %s252_s2, 32, %s254_s11, %s965_s10  }
  0x32   : > { %836 = dma.done.wait (%p80_p9), [#allocation5], 16  }
  0x33   : > { %838 = vsyncadd (%p80_p9), [#allocation5], 4294967280  ;;  %s1034_s0 = sand.u32 1, %s857_s16  }
  0x34   : > { %s566_s3 = sshll.u32 %s1034_s0, 3  ;;  %s270_s17 = scalar_lea.sflag [#allocation3], %s1034_s0 }
  0x35   : > { %s273_s19 = scalar_lea.vmem [#allocation6], %s566_s3 }
  0x36   : > { %840 = dma.done.wait (%p986_p13), %s270_s17, 128  }
  0x37   : > { %842 = vsyncadd (%p986_p13), %s270_s17, 4294967168  ;;  %s279_s2 = sand.u32 1, %s976_s14   ;;  %s1044_s21 = sshll.u32 %s1034_s0, 1 }
  0x38   : > { %s280_s24 = scalar_lea.sflag [#allocation8], %s279_s2  ;;  %s283_s25 = scalar_lea.vmem [#allocation7], %s1044_s21 }
  0x39   : > { %844 = dma.done.wait (%p986_p13), %s280_s24, 64  }
  0x3a   : > { %846 = vsyncadd (%p986_p13), %s280_s24, 4294967232  ;;  %s293_s27 = scalar_lea.vmem [#allocation9], %s1044_s21 }
  0x3b   : > { %299 = sfence }
  0x3c   : > { %v339_v0 = vld [vmem:[%s273_s19] sm:$0x3]  ;;  %v573_v1 = vld [vmem:[%s273_s19 + $0x2] sm:$0x3]  ;;  %v574_v3 = vld [vmem:[%s273_s19 + $0x4] sm:$0x3] }
  0x3d   : > { %v343_v2 = vmax.f32 %v339_v0, %v573_v1  ;;  %v575_v4 = vld [vmem:[%s273_s19 + $0x6] sm:$0x3]  ;;  %s330_s28 = sld [smem:[#allocation2]]  ;;  %v338_v15 = vld [vmem:[%s283_s25] sm:$0x3]  ;;  %s577_s23 = sshll.u32 %s865_s18, 1 }
  0x3e   : > { %s570_s10 = sld [smem:[#allocation2 + $0x1]]  ;;  %vm356_vm0 = vcmp.eq.s32.totalorder %v338_v15, 0  ;;  %vm363_vm1 = vcmp.eq.s32.totalorder %v338_v15, 1  ;;  %vm370_vm2 = vcmp.eq.s32.totalorder %v338_v15, 2  ;;  %vm377_vm3 = vcmp.eq.s32.totalorder %v338_v15, 3  ;;  %s406_s8 = scalar_lea.hbm %s1097_s4, %s577_s23 }
  0x3f   : > { %v347_v5 = vmax.f32 %v343_v2, %v574_v3  ;;  %s571_s13 = sld [smem:[#allocation2 + $0x2]]  ;;  %v390_v44 = vld [vmem:[%s293_s27] sm:$0x3]  ;;  %s329_s9 = scalar_lea.vmem [#allocation10], %s1044_s21 }
  0x40   : > { %s572_s14 = sld [smem:[#allocation2 + $0x3]]  ;;  %s408_s12 = sshll.u32 %s329_s9, 4  ;;  %s409_s12 = int_to_ptr.vmem [resolvable:$true] %s408_s12 }
  0x41   : > { %v351_v6 = vmax.f32 %v347_v5, %v575_v4  ;;  %s410_s22 = sshll.u32 %s406_s8, 4  ;;  %s395_s30 = scalar_lea.sflag [#allocation4], %s1034_s0  ;;  %s411_s22 = int_to_ptr.hbm [resolvable:$true] %s410_s22 }
  0x42   : > { %s797_s18 = sshra.s32 %s411_s22, 4  ;;  %s803_s17 = scalar_lea.hbm %s1097_s4, 4  ;;  %s798_s18 = int_to_ptr.hbm [resolvable:$true] %s797_s18 }
  0x43   : > { %v352_v7 = vsub.f32 %v339_v0, %v351_v6  ;;  %v359_v8 = vsub.f32 %v573_v1, %v351_v6  ;;  %v366_v9 = vsub.f32 %v574_v3, %v351_v6  ;;  %v373_v10 = vsub.f32 %v575_v4, %v351_v6  ;;  %s799_s5 = scalar_lea.hbm %s798_s18, 2  ;;  %p804_p10 = scmp.lt.s32.totalorder %s798_s18, %s1097_s4 }
  0x44   : > { %v331_v21 = vstv %s330_s28  ;;  %v333_v25 = vstv %s570_s10  ;;  %p800_p7 = scmp.ne.s32.totalorder %s798_s18, %s799_s5  ;;  %p805_p11 = scmp.lt.s32.totalorder %s803_s17, %s799_s5 }
  0x45   : > { %v353_v11 = vmul.f32 1.442695, %v352_v7  ;;  %v360_v12 = vmul.f32 1.442695, %v359_v8  ;;  %v367_v13 = vmul.f32 1.442695, %v366_v9  ;;  %v335_v28 = vstv %s571_s13 }
  0x46   : > { %v374_v14 = vmul.f32 1.442695, %v373_v10  ;;  %v357_v23 = vsel %vm356_vm0, %v352_v7, 0.0  ;;  %v358_v26 = vsel %vm356_vm0, %v331_v21, 0.0  ;;  %v337_v31 = vstv %s572_s14  ;;  %p801_p8 = pnand %p800_p7, %p993_p0  ;;  %p806_p12 = por %p805_p11, %p804_p10 }
  0x47   : > { %666 = vpow2.f32 %v353_v11  ;;  %v364_v27 = vsel %vm363_vm1, %v359_v8, %v357_v23  ;;  %v365_v29 = vsel %vm363_vm1, %v333_v25, %v358_v26 }
  0x48   : > { %668 = vpow2.f32 %v360_v12  ;;  %v371_v30 = vsel %vm370_vm2, %v366_v9, %v364_v27  ;;  %v372_v32 = vsel %vm370_vm2, %v335_v28, %v365_v29  ;;  %p802_p9 = pneg %p801_p8 }
  0x49   : > { %670 = vpow2.f32 %v367_v13  ;;  %v378_v34 = vsel %vm377_vm3, %v373_v10, %v371_v30  ;;  %v379_v36 = vsel %vm377_vm3, %v337_v31, %v372_v32 }
  0x4a   : > { %672 = vpow2.f32 %v374_v14  ;;  %p807_p13 = pnand %p806_p12, %p802_p9 }
  0x4d   : > { %v667_v16 = vpop.eup %666 }
  0x4e   : > { %v669_v17 = vpop.eup %668 }
  0x4f   : > { %v671_v18 = vpop.eup %670  ;;  %v362_v19 = vadd.f32 %v669_v17, %v667_v16 }
  0x50   : > { %v673_v20 = vpop.eup %672 }
  0x51   : > { %v369_v22 = vadd.f32 %v671_v18, %v362_v19 }
  0x53   : > { %v376_v24 = vadd.f32 %v673_v20, %v369_v22 }
  0x55   : > { %674 = vlog2.f32 %v376_v24 }
  0x5b   : > { %v675_v33 = vpop.eup %674 }
  0x5c   : > { %v381_v35 = vmul.f32 0.6931472, %v675_v33 }
  0x5e   : > { %v382_v37 = vsub.f32 %v381_v35, %v378_v34 }
  0x60   : > { %v383_v38 = vmul.f32 %v382_v37, %v379_v36 }
  0x62   : > { %v384_v39 = vsub.f32 0.0, %v383_v38 }
  0x64   : > { %v385_v40 = vmul.f32 1.442695, %v384_v39 }
  0x66   : > { %676 = vpow2.f32 %v385_v40 }
  0x6c   : > { %v677_v41 = vpop.eup %676 }
  0x6d   : > { %v387_v42 = vsub.f32 1.0, %v677_v41 }
  0x6f   : > { %v388_v43 = vmul.f32 %v387_v42, %v387_v42 }
  0x71   : > { %v389_v45 = vmul.f32 %v388_v43, %v383_v38 }
  0x73   : > { %v391_v46 = vmul.f32 %v390_v44, %v389_v45 }
  0x75   : > { %393 = vst [vmem:[%s329_s9] sm:$0x3] %v391_v46 }
  0x76   : > { %810 = shalt.err (!%p807_p13)
}
  0x77   : > { %591 = dma.vmem_to_hbm [thread:$0]  (%p993_p0), %s409_s12, 32, %s411_s22, %s395_s30  }
  0x78 PF: > { %s422_s0 = sand.u32 1, %s853_s15   ;;  %p608_p4 = pnand %p556_p3, %p997_p2 }
  0x79   : > { %s423_s21 = scalar_lea.sflag [#allocation4], %s422_s0 }
  0x7a   : > { %p609_p5 = pneg %p608_p4 }
  0x7c   : > { %848 = dma.done.wait (%p609_p5), %s423_s21, 32  }
  0x7d   : > { %850 = vsyncadd (%p609_p5), %s423_s21, 4294967264  ;;  %s24_s20 = sadd.s32 1, %s873_s20   ;;  %s1118_s24 = sld [smem:[#allocation15_spill]] }
  0x7e   : > { %p21_p1 = scmp.ge.s32.totalorder %s24_s20, 4   ;;  %s1119_s17 = sld [smem:[#allocation18_spill]] }
  0x7f   : > { %s1120_s18 = sld [smem:[#allocation16_spill]]  ;;  %s1122_s15 = smov %s857_s16 }
  0x80   : > { %s1121_s19 = sld [smem:[#allocation17_spill]]  ;;  %23 = sbr.rel (!%p21_p1) target bundleno = 13 (0xd), region = 113 }
  0x83   : > { %s1123_s16 = smov %s1118_s24 }
  0x85   :  { %429 = vsyncpa [#allocation3], 1 }
  0x86   :  { %431 = vsyncpa [#allocation3 + $0x1], 1 }
  0x87   :  { %432 = vsyncpa [#allocation8], 1 }
  0x88   :  { %434 = vsyncpa [#allocation8 + $0x1], 1 }
  0x89   :  { %435 = vsyncpa [#allocation4], 1 }
  0x8a   :  { %437 = vsyncpa [#allocation4 + $0x1], 1 }
  0x8b   :  { %438 = vsyncpa [#allocation5], 1 }
  0x8c   :  { %440 = vsyncpa [#allocation5 + $0x1], 1 }

</bundles_post_ra>
